<compile_context>
chip_gen: v6e
topology: v6e:2x2x1
jax: 0.10.0
libtpu: 0.0.40
codegen_flags: <defaults>
</compile_context>

<pallas_src>
import functools

import jax
import jax.numpy as jnp
import numpy as np
from jax.experimental import pallas as pl
from jax.experimental.pallas import tpu as pltpu


# ----------------------------- Pallas kernel ---------------------------------
def _srdb_kernel(x_ref, m_ref, w1x1_ref,
                 w1_ref, b1_ref, w2_ref, b2_ref, w3_ref, b3_ref,
                 w4_ref, b4_ref, w5_ref, b5_ref,
                 out_ref, slab, *, shifts):
    cf = x_ref.shape[1]
    hw = x_ref.shape[2]
    cg = w1_ref.shape[1]
    cdt = slab.dtype                                  # compute dtype for MXU operands

    x_f32 = x_ref[0].astype(jnp.float32)              # (cf, hw) residual path kept in f32
    slab[0:cf, :] = x_ref[0].astype(cdt)

    def lrelu(v):
        return jnp.where(v > 0.0, v, 0.2 * v)

    def conv3x3(cin, w_ref, b_ref):
        # 'same' 3x3 conv over the first `cin` rows of the concat slab:
        # 9 lane-dense dots (cout, cin) @ (cin, hw) with f32 accumulation; out-of-image taps are
        # zeroed by multiplying the dot output with a precomputed spatial mask.
        feats = slab[0:cin, :]                        # (cin, hw) in compute dtype
        cout = w_ref.shape[1]
        acc = jnp.zeros((cout, hw), jnp.float32)
        for t in range(9):
            k = shifts[t]
            src = feats if k == 0 else pltpu.roll(feats, shift=k, axis=1)
            part = jnp.dot(w_ref[t], src, preferred_element_type=jnp.float32)
            if k != 0:
                part = part * m_ref[pl.ds(t, 1), :]   # (1, hw) mask broadcast over channels
            acc = acc + part
        return acc + b_ref[...]                       # bias is (cout, 1), broadcasts over lanes

    x1 = lrelu(conv3x3(cf, w1_ref, b1_ref))
    slab[cf:cf + cg, :] = x1.astype(cdt)

    skip = jnp.dot(w1x1_ref[...], slab[0:cf, :],
                   preferred_element_type=jnp.float32)          # 1x1 conv skip on x
    x2 = lrelu(conv3x3(cf + cg, w2_ref, b2_ref)) + skip
    slab[cf + cg:cf + 2 * cg, :] = x2.astype(cdt)

    x3 = lrelu(conv3x3(cf + 2 * cg, w3_ref, b3_ref))
    slab[cf + 2 * cg:cf + 3 * cg, :] = x3.astype(cdt)

    x4 = lrelu(conv3x3(cf + 3 * cg, w4_ref, b4_ref)) + x2
    slab[cf + 3 * cg:cf + 4 * cg, :] = x4.astype(cdt)

    x5 = conv3x3(cf + 4 * cg, w5_ref, b5_ref)         # 0.2 residual scale folded into w5/b5
    out_ref[0] = (x5 + x_f32).astype(out_ref.dtype)


# --------------------- pltpu.roll convention probe (once) ---------------------
_ROLL_MATCHES_NUMPY = None


def _roll_matches_numpy():
    """pltpu.roll follows np.roll semantics (result[i] = x[i - shift]); probe once at runtime so a
    convention change across jax versions cannot silently shift every conv tap the wrong way."""
    global _ROLL_MATCHES_NUMPY
    if _ROLL_MATCHES_NUMPY is None:
        def probe(x_ref, o_ref):
            o_ref[...] = pltpu.roll(x_ref[...], shift=1, axis=1)

        x = jnp.tile(jnp.arange(128, dtype=jnp.float32)[None, :], (8, 1))
        y = pl.pallas_call(probe, out_shape=jax.ShapeDtypeStruct((8, 128), jnp.float32))(x)
        _ROLL_MATCHES_NUMPY = bool(np.asarray(jax.device_get(y))[0, 0] == 127.0)
    return _ROLL_MATCHES_NUMPY


# ------------------------------- Wrapper --------------------------------------
def star_rdb_pallas(x_nchw, params, *, compute_dtype=jnp.float32):
    """x_nchw: (N, Cf, H, W) float32.  Returns (N, Cf, H, W)."""
    N, Cf, H, W = x_nchw.shape
    HW = H * W
    Cg = params["w1"].shape[-1]
    Ctot = Cf + 4 * Cg

    x = x_nchw.reshape(N, Cf, HW)                     # free row-major reshape, no transpose

    # Static per-tap lane shifts and 'same'-padding validity masks (host-side, tiny).
    numpy_roll = _roll_matches_numpy()
    yy, xx = np.meshgrid(np.arange(H), np.arange(W), indexing="ij")
    shifts, masks = [], []
    for dy in range(3):
        for dx in range(3):
            ky, kx = dy - 1, dx - 1
            s = ky * W + kx                            # flattened source offset for this tap
            shifts.append(((-s) % HW) if numpy_roll else (s % HW))
            valid = (yy + ky >= 0) & (yy + ky < H) & (xx + kx >= 0) & (xx + kx < W)
            masks.append(valid.reshape(HW))
    shifts = tuple(shifts)
    masks = jnp.asarray(np.stack(masks), jnp.float32)  # (9, HW)

    def conv_w(w, scale=1.0):
        # HWIO (3,3,Cin,Cout) -> (9, Cout, Cin), tap index t = dy*3 + dx (scale folded in f32).
        co, ci = w.shape[-1], w.shape[-2]
        return (jnp.transpose(w, (0, 1, 3, 2)) * scale).reshape(9, co, ci).astype(compute_dtype)

    def bias(b, scale=1.0):
        return (b * scale).reshape(-1, 1).astype(jnp.float32)   # (Cout, 1)

    args = [
        x, masks,
        params["w1x1"].T.astype(compute_dtype),                 # (Cg, Cf)
        conv_w(params["w1"]), bias(params["b1"]),
        conv_w(params["w2"]), bias(params["b2"]),
        conv_w(params["w3"]), bias(params["b3"]),
        conv_w(params["w4"]), bias(params["b4"]),
        conv_w(params["w5"], 0.2), bias(params["b5"], 0.2),     # residual 0.2 folded into conv5
    ]

    def rep_spec(a):
        return pl.BlockSpec(a.shape, lambda n, _nd=a.ndim: (0,) * _nd)

    in_specs = [pl.BlockSpec((1, Cf, HW), lambda n: (n, 0, 0))]
    in_specs += [rep_spec(a) for a in args[1:]]

    out = pl.pallas_call(
        functools.partial(_srdb_kernel, shifts=shifts),
        out_shape=jax.ShapeDtypeStruct((N, Cf, HW), x_nchw.dtype),
        grid_spec=pltpu.PrefetchScalarGridSpec(
            num_scalar_prefetch=0,
            grid=(N,),
            in_specs=in_specs,
            out_specs=pl.BlockSpec((1, Cf, HW), lambda n: (n, 0, 0)),
            scratch_shapes=[pltpu.VMEM((Ctot, HW), compute_dtype)],   # single merged concat slab
        ),
        compiler_params=pltpu.CompilerParams(
            dimension_semantics=("parallel",),
            vmem_limit_bytes=64 * 1024 * 1024,
        ),
    )(*args)

    return out.reshape(N, Cf, H, W)


# --------------------------- Pure-JAX reference --------------------------------
def _conv2d_ref(x, w, b):
    y = jax.lax.conv_general_dilated(
        x, w, window_strides=(1, 1), padding="SAME",
        dimension_numbers=("NHWC", "HWIO", "NHWC"))
    return y + b


def star_rdb_ref(x_nchw, params):
    x = jnp.transpose(x_nchw, (0, 2, 3, 1))
    lrelu = lambda v: jnp.where(v > 0.0, v, 0.2 * v)
    cat = lambda *a: jnp.concatenate(a, axis=-1)

    x1 = lrelu(_conv2d_ref(x, params["w1"], params["b1"]))
    x2 = lrelu(_conv2d_ref(cat(x, x1), params["w2"], params["b2"]))
    x2 = x2 + jnp.einsum("nhwc,cd->nhwd", x, params["w1x1"])
    x3 = lrelu(_conv2d_ref(cat(x, x1, x2), params["w3"], params["b3"]))
    x4 = lrelu(_conv2d_ref(cat(x, x1, x2, x3), params["w4"], params["b4"])) + x2
    x5 = _conv2d_ref(cat(x, x1, x2, x3, x4), params["w5"], params["b5"])
    return jnp.transpose(x5 * 0.2 + x, (0, 3, 1, 2))


# --------------------------------- Main ----------------------------------------
if __name__ == "__main__":
    N, Cf, Cg, H, W = 2, 8, 4, 16, 16   # num_feat=8, num_grow_ch=4 (small synthetic shapes)

    key = jax.random.PRNGKey(0)
    ks = jax.random.split(key, 16)

    def nrm(k, shape, scale=0.1):
        return jax.random.normal(k, shape, jnp.float32) * scale

    params = {
        "w1x1": nrm(ks[0], (Cf, Cg)),
        "w1": nrm(ks[1], (3, 3, Cf, Cg)),            "b1": nrm(ks[2], (Cg,)),
        "w2": nrm(ks[3], (3, 3, Cf + Cg, Cg)),       "b2": nrm(ks[4], (Cg,)),
        "w3": nrm(ks[5], (3, 3, Cf + 2 * Cg, Cg)),   "b3": nrm(ks[6], (Cg,)),
        "w4": nrm(ks[7], (3, 3, Cf + 3 * Cg, Cg)),   "b4": nrm(ks[8], (Cg,)),
        "w5": nrm(ks[9], (3, 3, Cf + 4 * Cg, Cf)),   "b5": nrm(ks[10], (Cf,)),
    }

    x = jax.random.normal(ks[11], (N, Cf, H, W), jnp.float32)   # NCHW, like the torch module

    ref = jax.block_until_ready(star_rdb_ref(x, params))

    # f32 MXU operands: tight check against the f32 reference.
    out_f32 = jax.block_until_ready(star_rdb_pallas(x, params, compute_dtype=jnp.float32))
    np.testing.assert_allclose(np.asarray(out_f32), np.asarray(ref), atol=1e-4, rtol=1e-4)

    # bf16 MXU operands (v6e/v7x fast path), f32 accumulation/epilogue: looser tolerance.
    out_bf16 = jax.block_until_ready(star_rdb_pallas(x, params, compute_dtype=jnp.bfloat16))
    np.testing.assert_allclose(np.asarray(out_bf16), np.asarray(ref), atol=5e-2, rtol=5e-2)

    print("KERNEL_OK")
</pallas_src>

<mosaic_0001>
module attributes {stable_mosaic.version = 11 : i64} {
  func.func @probe(%arg0: memref<8x128xf32, #tpu.memory_space<vmem>>, %arg1: memref<8x128xf32, #tpu.memory_space<vmem>>) attributes {dimension_semantics = [], scalar_prefetch = 0 : i64, scratch_operands = 0 : i64, tpu.core_type = #tpu.core_type<tc>} {
    %c0 = arith.constant 0 : index
    %c0_0 = arith.constant 0 : index
    %0 = vector.load %arg0[%c0, %c0_0] : memref<8x128xf32, #tpu.memory_space<vmem>>, vector<8x128xf32>
    %c1_i32 = arith.constant 1 : i32
    %1 = tpu.dynamic_rotate %0 by %c1_i32 dim 1 : vector<8x128xf32>, i32 -> vector<8x128xf32>
    %c0_1 = arith.constant 0 : index
    %c0_2 = arith.constant 0 : index
    %2 = vector.load %arg1[%c0_1, %c0_2] : memref<8x128xf32, #tpu.memory_space<vmem>>, vector<8x128xf32>
    tpu.vector_store %arg1[%c0_1, %c0_2], %1 {strides = array<i32>} : memref<8x128xf32, #tpu.memory_space<vmem>>, vector<8x128xf32>,
    return
  }
}

</mosaic_0001>

<bundles_post_ra>
// kernel: tpu_custom_call.1
= control target key start
LH: loop header
LB: loop body
LE: loop exit
PB: predicated region body
PF: predicated region fallthrough
CT: control target
= control target key end

     0   :  { %6 = vsyncpa [#allocation3], 0  ;;  %s106_s0 = inlined_call_operand.hbm [shape: f32[8,128], index: 0, kind: input, shape index: {}]   ;;  %s107_s1 = inlined_call_operand.hbm [shape: f32[8,128], index: 1, kind: output, shape index: {}]  }
   0x1   :  { %7 = vsyncpa [#allocation4], 0  ;;  %s87_s6 = smov [#allocation2]  }
   0x2   :  { %s14_s7 = sshll.u32 %s87_s6, 4  ;;  %s15_s7 = int_to_ptr.vmem [resolvable:$true] %s14_s7 }
   0x3   :  { %s51_s8 = scalar_lea.vmem %s15_s7, 128  ;;  %p56_p1 = scmp.lt.s32.totalorder %s15_s7, %s15_s7 }
   0x4   :  { %p52_p0 = scmp.ne.s32.totalorder %s15_s7, %s51_s8  ;;  %p57_p2 = scmp.lt.s32.totalorder %s51_s8, %s51_s8 }
   0x6   :  { %p58_p3 = por %p57_p2, %p56_p1 }
   0x8   :  { %p59_p4 = pnand %p58_p3, %p52_p0 }
   0xa   :  { %62 = shalt.err (!%p59_p4)
}
   0xb   :  { %17 = dma.hbm_to_vmem [thread:$0]  %s106_s0, 128, %s15_s7, [#allocation3]  }
   0xc   :  { %83 = dma.done.wait [#allocation3], 128  }
   0xd   :  { %84 = vsyncadd [#allocation3], 4294967168  ;;  %v21_v0 = vld [vmem:[#allocation2] sm:$0xff]  ;;  %s88_s11 = smov 1   ;;  %s89_s12 = smov [#allocation5]  }
   0xe   :  { %22 = vrot.lane.b32.xlu0 %v21_v0, %s88_s11  ;;  %s31_s13 = sshll.u32 %s89_s12, 4  ;;  %s32_s13 = int_to_ptr.vmem [resolvable:$true] %s31_s13 }
   0xf   :  { %s63_s14 = scalar_lea.vmem %s32_s13, 128  ;;  %p68_p6 = scmp.lt.s32.totalorder %s32_s13, %s32_s13 }
  0x10   :  { %p64_p5 = scmp.ne.s32.totalorder %s32_s13, %s63_s14  ;;  %p69_p7 = scmp.lt.s32.totalorder %s63_s14, %s63_s14 }
  0x12   :  { %p70_p8 = por %p69_p7, %p68_p6 }
  0x14   :  { %p71_p9 = pnand %p70_p8, %p64_p5 }
  0x80   :  { %v23_v1 = vpop.permute.xlu0 %22 }
  0x81   :  { %24 = vst [vmem:[#allocation5] sm:$0xff] %v23_v1 }
  0x82   :  { %74 = shalt.err (!%p71_p9)
}
  0x83   :  { %34 = dma.vmem_to_hbm [thread:$0]  %s32_s13, 128, %s107_s1, [#allocation4]  }
  0x84   :  { %85 = dma.done.wait [#allocation4], 128  }
  0x85   :  { %86 = vsyncadd [#allocation4], 4294967168 }
  0x86   :  { %38 = vsyncpa [#allocation3], 1 }
  0x87   :  { %39 = vsyncpa [#allocation4], 1 }

</bundles_post_ra>
